<compile_context>
chip_gen: v6e
topology: v6e:2x2x1
jax: 0.10.0
libtpu: 0.0.40
codegen_flags: <defaults>
</compile_context>

<pallas_src>
import functools

import jax
import jax.numpy as jnp
from jax.experimental import pallas as pl
from jax.experimental.pallas import tpu as pltpu

NUM_CLASSES = 86
C_PAD = 128          # lane-dense width of the (tiny) accumulator output
EPSILON = 1e-7


def _round_up(x, m):
    return (x + m - 1) // m * m


def _f1_sums_kernel(n_rows, logits_ref, labels_ref, out_ref):
    """Accumulate per-class [tp; sum(probs)] over one batch tile.

    out_ref is a (2, C_PAD) accumulator block revisited across the inner
    ("arbitrary") grid axis: row 0 = tp, row 1 = colsum(probs).
    """
    i = pl.program_id(1)

    @pl.when(i == 0)
    def _init():
        out_ref[...] = jnp.zeros_like(out_ref)

    tn, c = logits_ref.shape                         # static block shape
    # Logical (unclamped) global row offset of this tile.
    blk = pl.program_id(0) * pl.num_programs(1) + i
    row_start = blk * tn
    row_ids = jax.lax.broadcasted_iota(jnp.int32, (tn, 1), 0) + row_start
    valid = row_ids < n_rows                         # (tn, 1) bool

    # Zero invalid (ragged-tail / duplicated-block) rows BEFORE exp: the
    # overhang region of the last partial block may contain arbitrary data.
    logits = jnp.where(valid, logits_ref[...], 0.0)  # (tn, 86) f32

    # Numerically stable softmax over classes; divide goes to the EUP and the
    # row-validity mask is folded into the (tn, 1) reciprocal column (no extra
    # full-tile multiply).
    m = jnp.max(logits, axis=1, keepdims=True)
    e = jnp.exp(logits - m)
    inv = pl.reciprocal(jnp.sum(e, axis=1, keepdims=True), approx=True)
    probs = e * jnp.where(valid, inv, 0.0)           # invalid rows -> zeros

    # tp = colsum(prob at the label column), via a vselect (no one-hot mul).
    labels = labels_ref[...]                         # (tn, 1) int32
    class_ids = jax.lax.broadcasted_iota(jnp.int32, (tn, c), 1)
    tp_row = jnp.sum(jnp.where(class_ids == labels, probs, 0.0),
                     axis=0, keepdims=True)          # (1, 86)
    psum_row = jnp.sum(probs, axis=0, keepdims=True)  # (1, 86)

    out_ref[0:1, :c] += tp_row
    out_ref[1:2, :c] += psum_row


@functools.partial(jax.jit, static_argnames=("tile_n",))
def f1_loss(y_pred, y_true, *, tile_n=8192):
    """y_pred: (N, 86) float32 logits; y_true: (N,) int labels. Returns scalar."""
    assert y_pred.ndim == 2
    assert y_true.ndim == 1
    n, c = y_pred.shape
    assert c == NUM_CLASSES

    logits = y_pred.astype(jnp.float32)              # (n, 86) — no pads/copies
    labels = y_true.astype(jnp.int32)

    # Batch tiling only; the class dim stays 86 (== full array dim).
    tile_n = max(8, min(_round_up(tile_n, 8), _round_up(n, 8)))
    num_tiles = pl.cdiv(n, tile_n)
    g_outer = 2 if num_tiles >= 2 else 1             # megacore split (v7x)
    g_inner = pl.cdiv(num_tiles, g_outer)

    # Labels are tiny (4*N bytes): pad them to the full grid extent.  Logits
    # are NOT padded; ragged tail / duplicate blocks are masked in-kernel.
    labels_padded = jnp.pad(labels, (0, g_outer * g_inner * tile_n - n),
                            constant_values=-1)[:, None]

    last_blk = num_tiles - 1

    def logits_map(g, i):
        # Clamp so blocks from megacore rounding never index past the array;
        # their contributions are zeroed by the in-kernel row mask.
        return (jnp.minimum(g * g_inner + i, last_blk), 0)

    def labels_map(g, i):
        return (g * g_inner + i, 0)

    partials = pl.pallas_call(
        functools.partial(_f1_sums_kernel, n),
        out_shape=jax.ShapeDtypeStruct((g_outer, 2, C_PAD), jnp.float32),
        grid_spec=pltpu.PrefetchScalarGridSpec(
            num_scalar_prefetch=0,
            grid=(g_outer, g_inner),
            in_specs=[
                pl.BlockSpec((tile_n, NUM_CLASSES), logits_map),
                pl.BlockSpec((tile_n, 1), labels_map),
            ],
            out_specs=pl.BlockSpec((None, 2, C_PAD), lambda g, i: (g, 0, 0)),
        ),
        compiler_params=pltpu.CompilerParams(
            dimension_semantics=("parallel", "arbitrary")),
        cost_estimate=pl.CostEstimate(
            flops=8 * n * NUM_CLASSES,
            transcendentals=n * NUM_CLASSES + n,
            bytes_accessed=4 * n * NUM_CLASSES + 4 * n
            + 4 * g_outer * 2 * C_PAD),
    )(logits, labels_padded)

    # Tiny (86,) epilogue in plain JAX: combine per-core partials, build the
    # label histogram (== colsum(one_hot)), recover fp/fn algebraically.
    sums = jnp.sum(partials, axis=0)                 # (2, C_PAD)
    tp = sums[0, :NUM_CLASSES]
    psum = sums[1, :NUM_CLASSES]
    cnt = jnp.zeros((NUM_CLASSES,), jnp.float32).at[labels].add(1.0, mode="drop")
    fp = psum - tp
    fn = cnt - tp

    precision = tp / (tp + fp + EPSILON)
    recall = tp / (tp + fn + EPSILON)
    f1 = 2.0 * (precision * recall) / (precision + recall + EPSILON)
    f1 = jnp.clip(f1, EPSILON, 1.0 - EPSILON)
    return 1.0 - jnp.mean(f1)


def f1_loss_ref(y_pred, y_true):
    """Pure-JAX reference mirroring the PyTorch forward."""
    y_true_oh = jax.nn.one_hot(y_true, NUM_CLASSES, dtype=jnp.float32)
    p = jax.nn.softmax(y_pred.astype(jnp.float32), axis=1)
    tp = jnp.sum(y_true_oh * p, axis=0)
    fp = jnp.sum((1.0 - y_true_oh) * p, axis=0)
    fn = jnp.sum(y_true_oh * (1.0 - p), axis=0)
    precision = tp / (tp + fp + EPSILON)
    recall = tp / (tp + fn + EPSILON)
    f1 = 2.0 * (precision * recall) / (precision + recall + EPSILON)
    f1 = jnp.clip(f1, EPSILON, 1.0 - EPSILON)
    return 1.0 - jnp.mean(f1)


if __name__ == "__main__":
    key = jax.random.PRNGKey(0)
    k_pred, k_true, k_pred2, k_true2 = jax.random.split(key, 4)

    # Small shape consistent with the module: batch=8, 86 classes.
    batch = 8
    y_pred = jax.random.normal(k_pred, (batch, NUM_CLASSES), dtype=jnp.float32)
    y_true = jax.random.randint(k_true, (batch,), 0, NUM_CLASSES, dtype=jnp.int32)

    loss = f1_loss(y_pred, y_true)
    jax.block_until_ready(loss)
    ref = f1_loss_ref(y_pred, y_true)
    assert jnp.isfinite(loss)
    # approx EUP reciprocal in the softmax gives ~2e-4 relative error in probs.
    assert jnp.allclose(loss, ref, rtol=1e-3, atol=2e-3), (loss, ref)

    # Ragged / multi-tile / megacore path: N not a multiple of tile_n and an
    # odd number of tiles (exercises the clamped duplicate block + row mask).
    n2 = 300
    y_pred2 = jax.random.normal(k_pred2, (n2, NUM_CLASSES), dtype=jnp.float32)
    y_true2 = jax.random.randint(k_true2, (n2,), 0, NUM_CLASSES, dtype=jnp.int32)
    loss2 = f1_loss(y_pred2, y_true2, tile_n=64)
    jax.block_until_ready(loss2)
    ref2 = f1_loss_ref(y_pred2, y_true2)
    assert jnp.isfinite(loss2)
    assert jnp.allclose(loss2, ref2, rtol=1e-3, atol=2e-3), (loss2, ref2)

    print("KERNEL_OK")
</pallas_src>

<mosaic_0001>
module attributes {stable_mosaic.version = 11 : i64} {
  func.func private @main(%arg0: i32) attributes {dimension_semantics = [#tpu.dimension_semantics<core_parallel>], iteration_bounds = array<i64: 2>, tpu.core_type = #tpu.core_type<sc_scalar_subcore>, window_params = []} {
    return
  }
}

module attributes {stable_mosaic.version = 11 : i64} {
  func.func private @main(%arg0: i32) attributes {dimension_semantics = [#tpu.dimension_semantics<core_parallel>], iteration_bounds = array<i64: 2>, tpu.core_type = #tpu.core_type<sc_scalar_subcore>, window_params = []} {
    return
  }
}

module attributes {stable_mosaic.version = 11 : i64} {
  func.func @_f1_sums_kernel(%arg0: i32, %arg1: i32, %arg2: memref<8x86xf32, #tpu.memory_space<vmem>>, %arg3: memref<8x1xi32, #tpu.memory_space<vmem>>, %arg4: memref<1x2x128xf32, #tpu.memory_space<vmem>>) attributes {dimension_semantics = [#tpu.dimension_semantics<parallel>, #tpu.dimension_semantics<arbitrary>], iteration_bounds = array<i64: 1, 1>, scalar_prefetch = 0 : i64, scratch_operands = 0 : i64, tpu.core_type = #tpu.core_type<tc>, window_params = [{transform_indices = @transform_0, window_bounds = array<i64: 8, 86>}, {transform_indices = @transform_1, window_bounds = array<i64: 8, 1>}, {transform_indices = @transform_2, window_bounds = array<i64: 1, 2, 128>}]} {
    %c0_i32 = arith.constant 0 : i32
    %0 = arith.cmpi eq, %arg1, %c0_i32 : i32
    %1 = arith.extui %0 : i1 to i32
    %c0_i32_0 = arith.constant 0 : i32
    %2 = arith.cmpi ne, %1, %c0_i32_0 : i32
    scf.if %2 {
      %cst_22 = arith.constant 0.000000e+00 : f32
      %50 = vector.broadcast %cst_22 : f32 to vector<2x128xf32>
      %c0_23 = arith.constant 0 : index
      %c0_24 = arith.constant 0 : index
      %c0_25 = arith.constant 0 : index
      %51 = vector.load %arg4[%c0_23, %c0_24, %c0_25] : memref<1x2x128xf32, #tpu.memory_space<vmem>>, vector<1x2x128xf32>
      %52 = vector.shape_cast %51 : vector<1x2x128xf32> to vector<2x128xf32>
      %53 = vector.shape_cast %50 : vector<2x128xf32> to vector<1x2x128xf32>
      tpu.vector_store %arg4[%c0_23, %c0_24, %c0_25], %53 {strides = array<i32>} : memref<1x2x128xf32, #tpu.memory_space<vmem>>, vector<1x2x128xf32>,
    } else {
    }
    %c1_i32 = arith.constant 1 : i32
    %3 = arith.muli %arg0, %c1_i32 : i32
    %4 = arith.addi %3, %arg1 : i32
    %c8_i32 = arith.constant 8 : i32
    %5 = arith.muli %4, %c8_i32 : i32
    %6 = tpu.iota {dimensions = array<i32: 0>} : vector<8x1xi32>
    %7 = vector.broadcast %5 : i32 to vector<8x1xi32>
    %8 = arith.addi %6, %7 : vector<8x1xi32>
    %c8_i32_1 = arith.constant 8 : i32
    %9 = vector.broadcast %c8_i32_1 : i32 to vector<8x1xi32>
    %10 = arith.cmpi slt, %8, %9 : vector<8x1xi32>
    %c0 = arith.constant 0 : index
    %c0_2 = arith.constant 0 : index
    %11 = vector.load %arg2[%c0, %c0_2] : memref<8x86xf32, #tpu.memory_space<vmem>>, vector<8x86xf32>
    %cst = arith.constant 0.000000e+00 : f32
    %12 = vector.shape_cast %10 : vector<8x1xi1> to vector<8x1xi1>
    %13 = vector.broadcast %12 : vector<8x1xi1> to vector<8x86xi1>
    %14 = vector.broadcast %cst : f32 to vector<8x86xf32>
    %15 = arith.select %13, %11, %14 : vector<8x86xi1>, vector<8x86xf32>
    %cst_3 = arith.constant dense<0xFF800000> : vector<8xf32>
    %16 = vector.multi_reduction <maximumf>, %15, %cst_3 [1] : vector<8x86xf32> to vector<8xf32>
    %17 = vector.shape_cast %16 : vector<8xf32> to vector<8x1xf32>
    %18 = vector.broadcast %17 : vector<8x1xf32> to vector<8x86xf32>
    %19 = arith.subf %15, %18 : vector<8x86xf32>
    %20 = math.exp %19 : vector<8x86xf32>
    %cst_4 = arith.constant dense<0.000000e+00> : vector<8xf32>
    %21 = vector.multi_reduction <add>, %20, %cst_4 [1] : vector<8x86xf32> to vector<8xf32>
    %22 = vector.shape_cast %21 : vector<8xf32> to vector<8x1xf32>
    %23 = tpu.reciprocal %22 {approx = true} : vector<8x1xf32> -> vector<8x1xf32>
    %cst_5 = arith.constant 0.000000e+00 : f32
    %24 = vector.broadcast %cst_5 : f32 to vector<8x1xf32>
    %25 = arith.select %10, %23, %24 : vector<8x1xi1>, vector<8x1xf32>
    %26 = vector.broadcast %25 : vector<8x1xf32> to vector<8x86xf32>
    %27 = arith.mulf %20, %26 : vector<8x86xf32>
    %c0_6 = arith.constant 0 : index
    %c0_7 = arith.constant 0 : index
    %28 = vector.load %arg3[%c0_6, %c0_7] : memref<8x1xi32, #tpu.memory_space<vmem>>, vector<8x1xi32>
    %29 = tpu.iota {dimensions = array<i32: 1>} : vector<8x86xi32>
    %30 = vector.broadcast %28 : vector<8x1xi32> to vector<8x86xi32>
    %31 = arith.cmpi eq, %29, %30 : vector<8x86xi32>
    %cst_8 = arith.constant 0.000000e+00 : f32
    %32 = vector.broadcast %cst_8 : f32 to vector<8x86xf32>
    %33 = arith.select %31, %27, %32 : vector<8x86xi1>, vector<8x86xf32>
    %cst_9 = arith.constant dense<0.000000e+00> : vector<86xf32>
    %34 = vector.multi_reduction <add>, %33, %cst_9 [0] : vector<8x86xf32> to vector<86xf32>
    %35 = vector.shape_cast %34 : vector<86xf32> to vector<1x86xf32>
    %cst_10 = arith.constant dense<0.000000e+00> : vector<86xf32>
    %36 = vector.multi_reduction <add>, %27, %cst_10 [0] : vector<8x86xf32> to vector<86xf32>
    %37 = vector.shape_cast %36 : vector<86xf32> to vector<1x86xf32>
    %c0_11 = arith.constant 0 : index
    %c0_12 = arith.constant 0 : index
    %c0_13 = arith.constant 0 : index
    %38 = vector.load %arg4[%c0_11, %c0_12, %c0_13] : memref<1x2x128xf32, #tpu.memory_space<vmem>>, vector<1x1x86xf32>
    %39 = vector.shape_cast %38 : vector<1x1x86xf32> to vector<1x86xf32>
    %40 = arith.addf %39, %35 : vector<1x86xf32>
    %c0_14 = arith.constant 0 : index
    %c0_15 = arith.constant 0 : index
    %c0_16 = arith.constant 0 : index
    %41 = vector.load %arg4[%c0_14, %c0_15, %c0_16] : memref<1x2x128xf32, #tpu.memory_space<vmem>>, vector<1x1x86xf32>
    %42 = vector.shape_cast %41 : vector<1x1x86xf32> to vector<1x86xf32>
    %43 = vector.shape_cast %40 : vector<1x86xf32> to vector<1x1x86xf32>
    tpu.vector_store %arg4[%c0_14, %c0_15, %c0_16], %43 {strides = array<i32>} : memref<1x2x128xf32, #tpu.memory_space<vmem>>, vector<1x1x86xf32>,
    %c0_17 = arith.constant 0 : index
    %c1 = arith.constant 1 : index
    %c0_18 = arith.constant 0 : index
    %44 = vector.load %arg4[%c0_17, %c1, %c0_18] : memref<1x2x128xf32, #tpu.memory_space<vmem>>, vector<1x1x86xf32>
    %45 = vector.shape_cast %44 : vector<1x1x86xf32> to vector<1x86xf32>
    %46 = arith.addf %45, %37 : vector<1x86xf32>
    %c0_19 = arith.constant 0 : index
    %c1_20 = arith.constant 1 : index
    %c0_21 = arith.constant 0 : index
    %47 = vector.load %arg4[%c0_19, %c1_20, %c0_21] : memref<1x2x128xf32, #tpu.memory_space<vmem>>, vector<1x1x86xf32>
    %48 = vector.shape_cast %47 : vector<1x1x86xf32> to vector<1x86xf32>
    %49 = vector.shape_cast %46 : vector<1x86xf32> to vector<1x1x86xf32>
    tpu.vector_store %arg4[%c0_19, %c1_20, %c0_21], %49 {strides = array<i32>} : memref<1x2x128xf32, #tpu.memory_space<vmem>>, vector<1x1x86xf32>,
    return
  }
  func.func @transform_0(%arg0: i32, %arg1: i32) -> (i32, i32) {
    %c1_i32 = arith.constant 1 : i32
    %0 = arith.muli %arg0, %c1_i32 : i32
    %1 = arith.addi %0, %arg1 : i32
    %c0_i32 = arith.constant 0 : i32
    %2 = arith.minsi %1, %c0_i32 : i32
    %c0_i32_0 = arith.constant 0 : i32
    %c0_i32_1 = arith.constant 0 : i32
    return %2, %c0_i32_0 : i32, i32
  }
  func.func @transform_1(%arg0: i32, %arg1: i32) -> (i32, i32) {
    %c1_i32 = arith.constant 1 : i32
    %0 = arith.muli %arg0, %c1_i32 : i32
    %1 = arith.addi %0, %arg1 : i32
    %c0_i32 = arith.constant 0 : i32
    %c0_i32_0 = arith.constant 0 : i32
    return %1, %c0_i32 : i32, i32
  }
  func.func @transform_2(%arg0: i32, %arg1: i32) -> (i32, i32, i32) {
    %c0_i32 = arith.constant 0 : i32
    %c0_i32_0 = arith.constant 0 : i32
    %c0_i32_1 = arith.constant 0 : i32
    return %arg0, %c0_i32, %c0_i32_0 : i32, i32, i32
  }
}

</mosaic_0001>

<bundles_post_ra>
// kernel: f1_loss.1
= control target key start
LH: loop header
LB: loop body
LE: loop exit
PB: predicated region body
PF: predicated region fallthrough
CT: control target
= control target key end

     0   :  { %vm71_vm0 = vcmask 703488   ;;  %v137_v2 = vmov 0   ;;  %v138_v9 = vmov 0.0   ;;  %v85_v11 = vlaneseq  ;;  %s179_s0 = inlined_call_operand.vmem [shape: f32[8,86], index: 0, kind: input, shape index: {}]   ;;  %s180_s1 = inlined_call_operand.vmem [shape: s32[8,1], index: 1, kind: input, shape index: {}]   ;;  %s181_s2 = inlined_call_operand.vmem [shape: f32[1,2,128], index: 2, kind: output, shape index: {}]  }
   0x1   :  { %v67_v0 = vld [vmem:[%s179_s0] sm:$0xff]  ;;  %131 = vset.pattern.permute.xlu1 %v137_v2  ;;  %132 = vset.pattern.permute.xlu0 %v137_v2  ;;  %59 = vst [vmem:[%s181_s2] sm:$0x3] %v138_v9  ;;  %vm108_vm2 = vcmask 696320  }
   0x2   :  { %v72_v1 = vsel %vm71_vm0, %v67_v0, -inf  ;;  %v84_v3 = vld [vmem:[%s180_s1] sm:$0xff]  ;;  %v86_v12 = vand.u32 127, %v85_v11 }
   0x3   :  { %73 = vmax.xlane.f32.xlu0 %v72_v1  ;;  %88 = vperm.xlu1 %131, %v84_v3  }
   0x8   :  { %v110_v28 = vld [vmem:[%s181_s2 + $0x1] sm:$0x1]  ;;  %v106_v30 = vld [vmem:[%s181_s2] sm:$0x1] }
  0x7e   :  { %v89_v13 = vpop.permute.xlu1 %88 }
  0x7f   :  { %vm90_vm1 = vcmp.eq.s32.totalorder %v86_v12, %v89_v13 }
  0x8c   :  { %v74_v4 = vpop.xlane.xlu0 %73 }
  0x8d   :  { %v75_v5 = vsub.f32 %v67_v0, %v74_v4 }
  0x8f   :  { %v76_v6 = vmul.f32 1.442695, %v75_v5 }
  0x91   :  { %133 = vpow2.f32 %v76_v6 }
  0x9e   :  { %v134_v7 = vpop.eup %133 }
  0x9f   :  { %v78_v8 = vsel %vm71_vm0, %v134_v7, 0.0 }
  0xa0   :  { %79 = vadd.xlane.f32.xlu0 %v78_v8 }
 0x129   :  { %v80_v10 = vpop.xlane.xlu0 %79 }
 0x12a   :  { %135 = vrcp.f32 %v80_v10 }
 0x137   :  { %v136_v14 = vpop.eup %135 }
 0x138   :  { %v83_v15 = vmul.f32 %v136_v14, %v134_v7 }
 0x13a   :  { %v91_v16 = vsel %vm90_vm1, %v83_v15, 0.0  ;;  %v99_v17 = vsel %vm71_vm0, %v83_v15, 0.0 }
 0x13b   :  { %v92_v18 = vsel %vm71_vm0, %v91_v16, 0.0  ;;  %v100_v19 = vrot.slane %v99_v17, 4 }
 0x13c   :  { %v93_v20 = vrot.slane %v92_v18, 4 }
 0x13d   :  { %v101_v21 = vadd.f32 %v100_v19, %v99_v17 }
 0x13e   :  { %v94_v22 = vadd.f32 %v93_v20, %v92_v18 }
 0x13f   :  { %v102_v23 = vrot.slane %v101_v21, 2 }
 0x140   :  { %v95_v24 = vrot.slane %v94_v22, 2 }
 0x141   :  { %v103_v25 = vadd.f32 %v102_v23, %v101_v21 }
 0x142   :  { %v96_v26 = vadd.f32 %v95_v24, %v94_v22 }
 0x143   :  { %v104_v27 = vrot.slane %v103_v25, 1 }
 0x144   :  { %v97_v29 = vrot.slane %v96_v26, 1 }
 0x145   :  { %v105_v31 = vadd.f32 %v104_v27, %v103_v25 }
 0x146   :  { %v98_v32 = vadd.f32 %v97_v29, %v96_v26 }
 0x147   :  { %v111_v33 = vadd.f32 %v110_v28, %v105_v31 }
 0x148   :  { %v107_v34 = vadd.f32 %v106_v30, %v98_v32 }
 0x149   :  { %112 = vst.msk [vmem:[%s181_s2 + $0x1] sm:$0x1] %vm108_vm2, %v111_v33 }
 0x14a   :  { %109 = vst.msk [vmem:[%s181_s2] sm:$0x1] %vm108_vm2, %v107_v34 }

</bundles_post_ra>
